<compile_context>
chip_gen: v7x
topology: tpu7x:2x2x1
jax: 0.10.0
libtpu: 0.0.40
codegen_flags: <defaults>
</compile_context>

<pallas_src>
import jax
import jax.numpy as jnp
from jax import lax
from jax.experimental import pallas as pl
from jax.experimental.pallas import tpu as pltpu

EPS = 1e-8  # PyTorch CosineSimilarity default eps


def f1_cosine_kernel(x_ref, xw_ref, op_ref, wt_ref, b_ref, out_ref):
    # Shapes seen per grid step (one batch tile of TB rows):
    #   x_ref  : [TB, N_o, d_o]   native layout, no wrapper transpose
    #   xw_ref : [TB, N_o]
    #   op_ref : [TB, d_c]
    #   wt_ref : [d_c, d_o]       Linear weight, pre-transposed in the wrapper
    #   b_ref  : [1, d_o]
    #   out_ref: [TB, N_o]
    op = op_ref[...]                                                 # [TB, d_c]
    wt = wt_ref[...]                                                 # [d_c, d_o]
    bias = b_ref[...]                                                # [1, d_o]

    # Batched Linear: one MXU matmul for the whole batch tile.
    p = jnp.dot(op, wt, preferred_element_type=jnp.float32) + bias   # [TB, d_o]

    x = x_ref[...].astype(jnp.float32)                               # [TB, N_o, d_o]
    pb = p[:, None, :]                                               # [TB, 1, d_o]

    # Cosine numerator and squared norms: VPU multiplies + one reduce over d_o
    # for the whole block (no per-row tiny matmuls).
    dot = jnp.sum(x * pb, axis=2)                                    # [TB, N_o]
    x_norm2 = jnp.sum(x * x, axis=2)                                 # [TB, N_o]
    p_norm2 = jnp.sum(p * p, axis=1, keepdims=True)                  # [TB, 1]

    # cos = dot / max(|x|*|p|, eps) == dot * rsqrt(max(|x|^2*|p|^2, eps^2))
    inv_norm = lax.rsqrt(jnp.maximum(x_norm2 * p_norm2, EPS * EPS))  # EUP rsqrt
    out_ref[...] = (xw_ref[...] * dot * inv_norm).astype(out_ref.dtype)


def _pick_batch_tile(B):
    """Whole batch in one step when small; otherwise an 8-multiple tile."""
    if B <= 1024:
        return B
    for tb in (1024, 512, 256, 128, 64, 32, 16, 8):
        if B % tb == 0:
            return tb
    return B  # fallback: single step with the full (ragged) batch


def f1_cosine_forward(X, X_weights_in, op, W, bias):
    """X: [B, N_o, d_o], X_weights_in: [B, N_o], op: [B, d_c],
    W: [d_o, d_c] (PyTorch Linear weight layout), bias: [d_o]."""
    B, N_o, d_o = X.shape
    d_c = op.shape[1]

    TB = _pick_batch_tile(B)
    num_blocks = B // TB

    # Cheap parameter-side plumbing only (no transpose/copy of X):
    W_t = W.T                                  # [d_c, d_o]  (32x16 param, free)
    bias2d = bias.reshape(1, d_o)              # [1, d_o]

    flops = B * (2 * d_c * d_o + d_o            # batched Linear
                 + 2 * d_o * N_o                # dot(X, P)
                 + 2 * d_o * N_o + 2 * d_o      # squared norms
                 + 4 * N_o)                     # clamp / rsqrt / muls
    bytes_accessed = 4 * (B * N_o * d_o + 2 * B * N_o + B * d_c
                          + d_c * d_o + d_o)

    out = pl.pallas_call(
        f1_cosine_kernel,
        out_shape=jax.ShapeDtypeStruct((B, N_o), X.dtype),
        grid=(num_blocks,),
        in_specs=[
            pl.BlockSpec((TB, N_o, d_o), lambda i: (i, 0, 0)),
            pl.BlockSpec((TB, N_o), lambda i: (i, 0)),
            pl.BlockSpec((TB, d_c), lambda i: (i, 0)),
            pl.BlockSpec((d_c, d_o), lambda i: (0, 0)),
            pl.BlockSpec((1, d_o), lambda i: (0, 0)),
        ],
        out_specs=pl.BlockSpec((TB, N_o), lambda i: (i, 0)),
        compiler_params=pltpu.CompilerParams(
            dimension_semantics=("parallel",)),
        cost_estimate=pl.CostEstimate(
            flops=flops, transcendentals=B * N_o,
            bytes_accessed=bytes_accessed),
    )(X, X_weights_in, op, W_t, bias2d)
    return out


def reference_forward(X, X_weights_in, op, W, bias):
    """Pure-JAX reference mirroring the PyTorch module.
    PyTorch CosineSimilarity: dot / max(|x1| * |x2|, eps)."""
    P = op @ W.T + bias                                           # [B, d_o]
    dot = jnp.sum(X * P[:, None, :], axis=2)
    denom = jnp.maximum(
        jnp.linalg.norm(X, axis=2) * jnp.linalg.norm(P, axis=1)[:, None], EPS)
    return X_weights_in * (dot / denom)


if __name__ == "__main__":
    # Small shapes consistent with the module: B=2, N_o=8, d_o=32, d_c=16
    B, N_o, d_o, d_c = 2, 8, 32, 16

    key = jax.random.PRNGKey(0)
    k1, k2, k3, k4, k5 = jax.random.split(key, 5)

    X = jax.random.normal(k1, (B, N_o, d_o), dtype=jnp.float32)
    X_weights_in = jax.random.uniform(k2, (B, N_o), dtype=jnp.float32)
    op = jax.random.normal(k3, (B, d_c), dtype=jnp.float32)

    # Deterministic "Linear(d_c, d_o)" parameters (PyTorch stores weight as [d_o, d_c]).
    bound = 1.0 / (d_c ** 0.5)
    W = jax.random.uniform(k4, (d_o, d_c), minval=-bound, maxval=bound,
                           dtype=jnp.float32)
    bias = jax.random.uniform(k5, (d_o,), minval=-bound, maxval=bound,
                              dtype=jnp.float32)

    out = f1_cosine_forward(X, X_weights_in, op, W, bias)
    out = jax.block_until_ready(out)

    ref = reference_forward(X, X_weights_in, op, W, bias)
    assert out.shape == (B, N_o)
    assert jnp.allclose(out, ref, atol=1e-5, rtol=1e-4), "mismatch vs reference"

    print("KERNEL_OK")
</pallas_src>

<mosaic_0001>
module attributes {stable_mosaic.version = 11 : i64} {
  func.func @f1_cosine_kernel(%arg0: i32, %arg1: memref<2x8x32xf32, #tpu.memory_space<vmem>>, %arg2: memref<2x8xf32, #tpu.memory_space<vmem>>, %arg3: memref<2x16xf32, #tpu.memory_space<vmem>>, %arg4: memref<16x32xf32, #tpu.memory_space<vmem>>, %arg5: memref<1x32xf32, #tpu.memory_space<vmem>>, %arg6: memref<2x8xf32, #tpu.memory_space<vmem>>) attributes {dimension_semantics = [#tpu.dimension_semantics<parallel>], iteration_bounds = array<i64: 1>, scalar_prefetch = 0 : i64, scratch_operands = 0 : i64, tpu.core_type = #tpu.core_type<tc>, window_params = [{transform_indices = @transform_0, window_bounds = array<i64: 2, 8, 32>}, {transform_indices = @transform_1, window_bounds = array<i64: 2, 8>}, {transform_indices = @transform_2, window_bounds = array<i64: 2, 16>}, {pipeline_mode = #tpu.pipeline_mode<synchronous>, transform_indices = @transform_3, window_bounds = array<i64: 16, 32>}, {pipeline_mode = #tpu.pipeline_mode<synchronous>, transform_indices = @transform_4, window_bounds = array<i64: 1, 32>}, {transform_indices = @transform_5, window_bounds = array<i64: 2, 8>}]} {
    %c0 = arith.constant 0 : index
    %c0_0 = arith.constant 0 : index
    %0 = vector.load %arg3[%c0, %c0_0] : memref<2x16xf32, #tpu.memory_space<vmem>>, vector<2x16xf32>
    %c0_1 = arith.constant 0 : index
    %c0_2 = arith.constant 0 : index
    %1 = vector.load %arg4[%c0_1, %c0_2] : memref<16x32xf32, #tpu.memory_space<vmem>>, vector<16x32xf32>
    %c0_3 = arith.constant 0 : index
    %c0_4 = arith.constant 0 : index
    %2 = vector.load %arg5[%c0_3, %c0_4] : memref<1x32xf32, #tpu.memory_space<vmem>>, vector<1x32xf32>
    %cst = arith.constant dense<0.000000e+00> : vector<2x32xf32>
    %3 = tpu.matmul %0, %1, %cst {dimension_numbers = #tpu.dot_dimension_numbers<[1], [0], [0], [1], [0, 0, 1, 1], [], []>} : vector<2x16xf32>, vector<16x32xf32>, vector<2x32xf32> -> vector<2x32xf32>
    %4 = vector.broadcast %2 : vector<1x32xf32> to vector<2x32xf32>
    %5 = arith.addf %3, %4 : vector<2x32xf32>
    %c0_5 = arith.constant 0 : index
    %c0_6 = arith.constant 0 : index
    %c0_7 = arith.constant 0 : index
    %6 = vector.load %arg1[%c0_5, %c0_6, %c0_7] : memref<2x8x32xf32, #tpu.memory_space<vmem>>, vector<2x8x32xf32>
    %7 = vector.shape_cast %5 : vector<2x32xf32> to vector<2x1x32xf32>
    %8 = vector.broadcast %7 : vector<2x1x32xf32> to vector<2x8x32xf32>
    %9 = arith.mulf %6, %8 : vector<2x8x32xf32>
    %cst_8 = arith.constant dense<0.000000e+00> : vector<2x8xf32>
    %10 = vector.multi_reduction <add>, %9, %cst_8 [2] : vector<2x8x32xf32> to vector<2x8xf32>
    %11 = arith.mulf %6, %6 : vector<2x8x32xf32>
    %cst_9 = arith.constant dense<0.000000e+00> : vector<2x8xf32>
    %12 = vector.multi_reduction <add>, %11, %cst_9 [2] : vector<2x8x32xf32> to vector<2x8xf32>
    %13 = arith.mulf %5, %5 : vector<2x32xf32>
    %cst_10 = arith.constant dense<0.000000e+00> : vector<2xf32>
    %14 = vector.multi_reduction <add>, %13, %cst_10 [1] : vector<2x32xf32> to vector<2xf32>
    %15 = vector.shape_cast %14 : vector<2xf32> to vector<2x1xf32>
    %16 = vector.broadcast %15 : vector<2x1xf32> to vector<2x8xf32>
    %17 = arith.mulf %12, %16 : vector<2x8xf32>
    %cst_11 = arith.constant 1.000000e-16 : f32
    %18 = vector.broadcast %cst_11 : f32 to vector<2x8xf32>
    %19 = arith.maximumf %17, %18 : vector<2x8xf32>
    %20 = math.rsqrt %19 : vector<2x8xf32>
    %c0_12 = arith.constant 0 : index
    %c0_13 = arith.constant 0 : index
    %21 = vector.load %arg2[%c0_12, %c0_13] : memref<2x8xf32, #tpu.memory_space<vmem>>, vector<2x8xf32>
    %22 = arith.mulf %21, %10 : vector<2x8xf32>
    %23 = arith.mulf %22, %20 : vector<2x8xf32>
    %c0_14 = arith.constant 0 : index
    %c0_15 = arith.constant 0 : index
    %24 = vector.load %arg6[%c0_14, %c0_15] : memref<2x8xf32, #tpu.memory_space<vmem>>, vector<2x8xf32>
    tpu.vector_store %arg6[%c0_14, %c0_15], %23 {strides = array<i32>} : memref<2x8xf32, #tpu.memory_space<vmem>>, vector<2x8xf32>,
    return
  }
  func.func @transform_0(%arg0: i32) -> (i32, i32, i32) {
    %c0_i32 = arith.constant 0 : i32
    %c0_i32_0 = arith.constant 0 : i32
    %c0_i32_1 = arith.constant 0 : i32
    return %arg0, %c0_i32, %c0_i32_0 : i32, i32, i32
  }
  func.func @transform_1(%arg0: i32) -> (i32, i32) {
    %c0_i32 = arith.constant 0 : i32
    %c0_i32_0 = arith.constant 0 : i32
    return %arg0, %c0_i32 : i32, i32
  }
  func.func @transform_2(%arg0: i32) -> (i32, i32) {
    %c0_i32 = arith.constant 0 : i32
    %c0_i32_0 = arith.constant 0 : i32
    return %arg0, %c0_i32 : i32, i32
  }
  func.func @transform_3(%arg0: i32) -> (i32, i32) {
    %c0_i32 = arith.constant 0 : i32
    %c0_i32_0 = arith.constant 0 : i32
    %c0_i32_1 = arith.constant 0 : i32
    return %c0_i32, %c0_i32_0 : i32, i32
  }
  func.func @transform_4(%arg0: i32) -> (i32, i32) {
    %c0_i32 = arith.constant 0 : i32
    %c0_i32_0 = arith.constant 0 : i32
    %c0_i32_1 = arith.constant 0 : i32
    return %c0_i32, %c0_i32_0 : i32, i32
  }
  func.func @transform_5(%arg0: i32) -> (i32, i32) {
    %c0_i32 = arith.constant 0 : i32
    %c0_i32_0 = arith.constant 0 : i32
    return %arg0, %c0_i32 : i32, i32
  }
}

</mosaic_0001>

<bundles_post_ra>
// kernel: tpu_custom_call.1
= control target key start
LH: loop header
LB: loop body
LE: loop exit
PB: predicated region body
PF: predicated region fallthrough
CT: control target
= control target key end

     0   :  { %10 = vsyncpa [#allocation3], 0  ;;  %s453_s0 = inlined_call_operand.hbm [shape: f32[2,8,32], index: 0, kind: input, shape index: {}]   ;;  %s454_s1 = inlined_call_operand.vmem [shape: f32[2,8], index: 1, kind: input, shape index: {}]   ;;  %s455_s2 = inlined_call_operand.vmem [shape: f32[2,16], index: 2, kind: input, shape index: {}]   ;;  %s456_s3 = inlined_call_operand.hbm [shape: f32[16,32], index: 3, kind: input, shape index: {}]   ;;  %s457_s4 = inlined_call_operand.vmem [shape: f32[1,32], index: 4, kind: input, shape index: {}]   ;;  %s458_s5 = inlined_call_operand.hbm [shape: f32[2,8], index: 5, kind: output, shape index: {}]  }
   0x1   :  { %11 = vsyncpa [#allocation6], 0 }
   0x2   :  { %12 = vsyncpa [#allocation4], 0  ;;  %s364_s18 = smov [#allocation2]   ;;  %s292_s22 = scalar_lea.hbm %s453_s0, 256 }
   0x3   :  { %s18_s19 = sshll.u32 %s364_s18, 4  ;;  %p293_p0 = scmp.ne.s32.totalorder %s453_s0, %s292_s22  ;;  %s19_s19 = int_to_ptr.vmem [resolvable:$true] %s18_s19 }
   0x4   :  { %p296_p1 = scmp.lt.u32.totalorder %s292_s22, %s453_s0 }
   0x6   :  { %p298_p2 = pnand %p296_p1, %p293_p0 }
   0x8   :  { %301 = shalt.err (!%p298_p2)
}
   0x9   :  { %s302_s27 = scalar_lea.vmem %s19_s19, 256  ;;  %p307_p4 = scmp.lt.s32.totalorder %s19_s19, %s19_s19 }
   0xa   :  { %p303_p3 = scmp.ne.s32.totalorder %s19_s19, %s302_s27  ;;  %p308_p5 = scmp.lt.s32.totalorder %s302_s27, %s302_s27 }
   0xc   :  { %p309_p6 = por %p308_p5, %p307_p4 }
   0xe   :  { %p310_p7 = pnand %p309_p6, %p303_p3 }
  0x10   :  { %313 = shalt.err (!%p310_p7)
}
  0x11   :  { %s365_s28 = smov 128   ;;  %s366_s29 = smov 8  }
  0x12   :  { %24 = dma.hbm_to_vmem [thread:$0]  %s453_s0, 256, %s19_s19, [#allocation3], %s365_s28, %s365_s28, %s366_s29  }
  0x13   :  { %s367_s7 = smov [#allocation5]   ;;  %s314_s11 = scalar_lea.hbm %s456_s3, 256 }
  0x14   :  { %s34_s8 = sshll.u32 %s367_s7, 4  ;;  %p315_p8 = scmp.ne.s32.totalorder %s456_s3, %s314_s11  ;;  %s35_s8 = int_to_ptr.vmem [resolvable:$true] %s34_s8 }
  0x15   :  { %p318_p9 = scmp.lt.u32.totalorder %s314_s11, %s456_s3 }
  0x17   :  { %p320_p10 = pnand %p318_p9, %p315_p8 }
  0x19   :  { %323 = shalt.err (!%p320_p10)
}
  0x1a   :  { %s324_s16 = scalar_lea.vmem %s35_s8, 256  ;;  %p329_p12 = scmp.lt.s32.totalorder %s35_s8, %s35_s8 }
  0x1b   :  { %p325_p11 = scmp.ne.s32.totalorder %s35_s8, %s324_s16  ;;  %p330_p13 = scmp.lt.s32.totalorder %s324_s16, %s324_s16 }
  0x1d   :  { %p331_p0 = por %p330_p13, %p329_p12 }
  0x1f   :  { %p332_p1 = pnand %p331_p0, %p325_p11 }
  0x21   :  { %335 = shalt.err (!%p332_p1)
}
  0x22   :  { %40 = dma.hbm_to_vmem [thread:$0]  %s456_s3, 256, %s35_s8, [#allocation6], %s365_s28, %s365_s28, %s366_s29  }
  0x23   :  { %358 = dma.done.wait [#allocation3], 256  }
  0x24   :  { %359 = vsyncadd [#allocation3], 4294967040 }
  0x25   :  { %360 = dma.done.wait [#allocation6], 256  }
  0x26   :  { %361 = vsyncadd [#allocation6], 4294967040  ;;  %v368_v0 = vmov 0.0|0.0   ;;  %vm369_vm0 = vmmov 0   ;;  %v370_v1 = vmov 0.0   ;;  %v50_v2 = vld [vmem:[#allocation5] sm:$0xff]  ;;  %v139_v11 = vlaneseq }
  0x27   :  { %273 = vmatprep.subr.bf16.mxu0 %v368_v0  ;;  %270 = vmatprep.mubr.msk.f32.mxu0 %vm369_vm0, %v370_v1  ;;  %v51_v3 = vld [vmem:[#allocation5 + $0x8] sm:$0xff]  ;;  %v49_v5 = vld [vmem:[%s455_s2] sm:$0x3]  ;;  %vm59_vm1 = vcmask 130048   ;;  %v134_v6 = vld [vmem:[#allocation2 + $0x8] sm:$0xff]  ;;  %vm170_vm2 = vcmask 261120  }
  0x28   :  { %v274_v4 = vpack.c.bf16 %v51_v3, %v50_v2  ;;  %v178_v7 = vmul.f32 %v134_v6, %v134_v6  ;;  %v371_v9 = vmov 1966171168   ;;  %v140_v13 = vshrl.u32 %v139_v11, 7  ;;  %v261_v14 = vld [vmem:[%s457_s4] ss:$0 sm:$0xff]  ;;  %s373_s21 = smov [#allocation7]  }
  0x29   :  { %v137_v10 = vunpack.c.l.s4 %v371_v9  ;;  %v133_v17 = vld [vmem:[#allocation2] sm:$0xff]  ;;  %vm186_vm3 = vcmask 254976   ;;  %v372_v35 = vmov 0   ;;  %v211_v48 = vand.u32 127, %v139_v11  ;;  %s251_s22 = sshll.u32 %s373_s21, 4  ;;  %s252_s22 = int_to_ptr.vmem [resolvable:$true] %s251_s22 }
  0x2a   :  { %275 = vmatpush3.bf16.msra.mxu0 %v274_v4  ;;  %v182_v8 = vsel %vm170_vm2, %v178_v7, 0.0  ;;  %v177_v22 = vmul.f32 %v133_v17, %v133_v17  ;;  %v160_v23 = vsub.s32 0, %v140_v13  ;;  %287 = vset.pattern.permute.xlu0 %v372_v35  ;;  %v197_v36 = vsub.s32 1, %v140_v13  ;;  %v207_v55 = vld [vmem:[%s454_s1] sm:$0x3]  ;;  %s336_s23 = scalar_lea.vmem %s252_s22, 32  ;;  %p341_p3 = scmp.lt.s32.totalorder %s252_s22, %s252_s22 }
  0x2b   :  { %183 = vadd.xlane.f32.xlu1 %v182_v8  ;;  %v138_v12 = vunpack.c.0.s8 %v137_v10  ;;  %v214_v50 = vsub.s32 %v211_v48, %v140_v13  ;;  %vm220_vm4 = vcmask 1041409   ;;  %vm243_vm5 = vcmask 58368   ;;  %p337_p2 = scmp.ne.s32.totalorder %s252_s22, %s336_s23  ;;  %p342_p4 = scmp.lt.s32.totalorder %s336_s23, %s336_s23 }
  0x2c   :  { %v179_v27 = vsel %vm170_vm2, %v177_v22, 0.0  ;;  %286 = vset.pattern.permute.xlu1 %v372_v35 }
  0x2d   :  { %271 = vmatmul.mubr.msk.f32.vlgmr.msra.gmra.mrb[0].mxu0 %vm59_vm1, %v49_v5  ;;  %v141_v15 = vsub.s32 %v138_v12, %v140_v13  ;;  %p343_p5 = por %p342_p4, %p341_p3 }
  0x2f   :  { %p344_p6 = pnand %p343_p5, %p337_p2 }
  0xb8   :  { %v184_v38 = vpop.xlane.xlu1 %183 }
 0x100   :  { %v129_v16 = vpop.f32.mrb[0].mxu0 }
 0x101   :  { %v130_v18 = vadd.f32 %v261_v14, %v129_v16  ;;  %v272_v19 = vpop.f32.mrb[1].mxu0 }
 0x103   :  { %v142_v20 = vrot.slane %v130_v18, %v141_v15  ;;  %v185_v21 = vmul.f32 %v130_v18, %v130_v18 }
 0x105   :  { %v143_v24 = vcombine.high %v142_v20, %v142_v20  ;;  %v150_v25 = vrot.slane %v142_v20, %v141_v15  ;;  %v187_v26 = vsel %vm186_vm3, %v185_v21, 0.0 }
 0x106   :  { %188 = vadd.xlane.f32.xlu0 %v187_v26 }
 0x107   :  { %v161_v28 = vrot.slane %v150_v25, %v160_v23  ;;  %v157_v29 = vrot.slane %v143_v24, %v141_v15 }
 0x109   :  { %v168_v30 = vmul.f32 %v161_v28, %v133_v17  ;;  %v165_v31 = vrot.slane %v157_v29, %v160_v23 }
 0x10a   :  { %180 = vadd.xlane.f32.xlu0 %v179_v27 }
 0x10b   :  { %v171_v32 = vsel %vm170_vm2, %v168_v30, 0.0  ;;  %v169_v33 = vmul.f32 %v165_v31, %v134_v6 }
 0x10c   :  { %172 = vadd.xlane.f32.xlu1 %v171_v32 }
 0x10d   :  { %v174_v34 = vsel %vm170_vm2, %v169_v33, 0.0 }
 0x10e   :  { %175 = vadd.xlane.f32.xlu0 %v174_v34 }
 0x193   :  { %v189_v37 = vpop.xlane.xlu0 %188 }
 0x194   :  { %v198_v39 = vrot.slane %v189_v37, %v197_v36  ;;  %v194_v40 = vrot.slane %v189_v37, %v160_v23 }
 0x196   :  { %v202_v41 = vmul.f32 %v198_v39, %v184_v38 }
 0x197   :  { %v181_v42 = vpop.xlane.xlu0 %180 }
 0x198   :  { %v204_v43 = vmax.f32 %v202_v41, 1e-16  ;;  %v201_v44 = vmul.f32 %v194_v40, %v181_v42 }
 0x199   :  { %v173_v51 = vpop.xlane.xlu1 %172 }
 0x19a   :  { %288 = vrsqrt.f32 %v204_v43  ;;  %v203_v45 = vmax.f32 %v201_v44, 1e-16  ;;  %v215_v53 = vrot.slane %v173_v51, %v214_v50 }
 0x19b   :  { %v176_v49 = vpop.xlane.xlu0 %175 }
 0x19c   :  { %290 = vrsqrt.f32 %v203_v45  ;;  %v219_v52 = vrot.slane %v176_v49, %v214_v50 }
 0x19e   :  { %v221_v56 = vsel %vm220_vm4, %v219_v52, %v215_v53 }
 0x19f   :  { %v223_v60 = vmul.f32 %v221_v56, %v207_v55 }
 0x1a4   :  { %v289_v46 = vpop.eup %288 }
 0x1a5   :  { %230 = vperm.xlu0 %287, %v289_v46  }
 0x1a6   :  { %v291_v47 = vpop.eup %290 }
 0x1a7   :  { %227 = vperm.xlu1 %286, %v291_v47  }
 0x224   :  { %v231_v54 = vpop.permute.xlu0 %230 }
 0x225   :  { %v239_v58 = vrot.slane %v231_v54, %v214_v50 }
 0x226   :  { %v228_v57 = vpop.permute.xlu1 %227 }
 0x227   :  { %v235_v59 = vrot.slane %v228_v57, %v214_v50 }
 0x229   :  { %v240_v61 = vsel %vm220_vm4, %v239_v58, %v235_v59 }
 0x22a   :  { %v242_v62 = vmul.f32 %v240_v61, %v223_v60 }
 0x22c   :  { %244 = vst.msk [vmem:[#allocation7] sm:$0x3] %vm243_vm5, %v242_v62 }
 0x22d   :  { %347 = shalt.err (!%p344_p6)
}
 0x22e   :  { %s348_s25 = scalar_lea.hbm %s458_s5, 32 }
 0x22f   :  { %p349_p7 = scmp.ne.s32.totalorder %s458_s5, %s348_s25  ;;  %p352_p8 = scmp.lt.u32.totalorder %s348_s25, %s458_s5 }
 0x231   :  { %p354_p9 = pnand %p352_p8, %p349_p7 }
 0x233   :  { %357 = shalt.err (!%p354_p9)
}
 0x234   :  { %254 = dma.vmem_to_hbm [thread:$0]  %s252_s22, 32, %s458_s5, [#allocation4]  }
 0x235   :  { %362 = dma.done.wait [#allocation4], 32  }
 0x236   :  { %363 = vsyncadd [#allocation4], 4294967264 }
 0x237   :  { %258 = vsyncpa [#allocation3], 1 }
 0x238   :  { %259 = vsyncpa [#allocation6], 1 }
 0x239   :  { %260 = vsyncpa [#allocation4], 1 }

</bundles_post_ra>
